<compile_context>
chip_gen: v5e
topology: v5e:2x2
jax: 0.10.0
libtpu: 0.0.40
codegen_flags: <defaults>
</compile_context>

<pallas_src>
import functools
import math

import jax
import jax.numpy as jnp
from jax.experimental import pallas as pl
from jax.experimental.pallas import tpu as pltpu


def _round_up(n, m):
    return ((n + m - 1) // m) * m


def _nbytes(shape, dtype):
    return math.prod(shape) * jnp.dtype(dtype).itemsize


def _mlp_kernel(n_layers, eps, inv_b, mxu_dtype, x_ref, *refs):
    """Fused (Linear -> BatchNorm1d(batch stats) -> ReLU) x n_layers -> Linear."""
    out_ref = refs[-1]
    b_last_ref = refs[-2]          # [1, c_pad] f32
    w_last_ref = refs[-3]          # [h_pad, c_pad] mxu_dtype
    gb_ref = refs[-4]              # packed [2*n_layers, h_pad] f32: row 2i=gamma_i, 2i+1=beta_i
    w_refs = refs[:n_layers]       # per-layer [in_pad, h_pad] mxu_dtype

    h = x_ref[...]
    for i in range(n_layers):
        # Linear, no bias (bias before training-mode BN is a mathematical no-op). MXU.
        y = jnp.dot(h.astype(mxu_dtype), w_refs[i][...],
                    preferred_element_type=jnp.float32)

        # BatchNorm1d training-mode stats over the batch axis (one-pass form).
        mean = jnp.sum(y, axis=0, keepdims=True) * inv_b             # [1, F]
        mean_sq = jnp.sum(y * y, axis=0, keepdims=True) * inv_b      # [1, F]
        var = jnp.maximum(mean_sq - mean * mean, 0.0)                # biased variance

        gamma = gb_ref[2 * i:2 * i + 1, :]
        beta = gb_ref[2 * i + 1:2 * i + 2, :]
        scale = gamma * jax.lax.rsqrt(var + eps)                     # [1, F]  (EUP rsqrt)
        shift = beta - mean * scale                                  # [1, F]

        # Folded normalize+affine, then ReLU: mul + add + max on the [B, F] tensor.
        h = jnp.maximum(y * scale + shift, 0.0)

    # output = layers[-1](activation(hidden)); h >= 0 already, so the extra ReLU is dropped.
    out = jnp.dot(h.astype(mxu_dtype), w_last_ref[...],
                  preferred_element_type=jnp.float32) + b_last_ref[...]
    out_ref[...] = out.astype(out_ref.dtype)


def mlp_forward(x, hidden_params, final_w, final_b, *, eps=1e-5,
                mxu_dtype=jnp.bfloat16):
    """Forward pass of MultiLayerPerceptron.

    x:             [B, x_dim] activations.
    hidden_params: list of (w[in,out], b[out], gamma[out], beta[out]) per hidden layer.
                   (b is accepted for API parity; it is a no-op before training-mode BN.)
    final_w:       [h_dim, n_classes]; final_b: [n_classes].
    """
    n_layers = len(hidden_params)
    B, x_dim = x.shape
    h_dim = hidden_params[0][0].shape[1]
    n_classes = final_w.shape[1]

    # Pad all feature dims to 128-lane multiples (lane-dense vregs, unmasked stores).
    x_pad = _round_up(x_dim, 128)
    h_pad = _round_up(h_dim, 128)
    c_pad = _round_up(n_classes, 128)

    x_p = jnp.pad(x, ((0, 0), (0, x_pad - x_dim))).astype(mxu_dtype)

    w_list = []
    gb_rows = []
    in_dim, in_pad = x_dim, x_pad
    for (w, _b, g, beta) in hidden_params:
        w_p = jnp.pad(w, ((0, in_pad - in_dim), (0, h_pad - h_dim))).astype(mxu_dtype)
        w_list.append(w_p)
        # Zero-pad gamma/beta so padded lanes stay exactly zero after BN.
        gb_rows.append(jnp.pad(g.reshape(1, -1), ((0, 0), (0, h_pad - h_dim))))
        gb_rows.append(jnp.pad(beta.reshape(1, -1), ((0, 0), (0, h_pad - h_dim))))
        in_dim, in_pad = h_dim, h_pad
    gb_packed = jnp.concatenate(gb_rows, axis=0).astype(jnp.float32)   # [2*n_layers, h_pad]

    wl_p = jnp.pad(final_w, ((0, h_pad - h_dim), (0, c_pad - n_classes))).astype(mxu_dtype)
    bl_p = jnp.pad(final_b.reshape(1, -1), ((0, 0), (0, c_pad - n_classes))).astype(jnp.float32)

    flat_inputs = [x_p] + w_list + [gb_packed, wl_p, bl_p]
    vmem_spec = pl.BlockSpec(memory_space=pltpu.MemorySpace.VMEM)

    flops = 2 * B * (x_pad * h_pad + (n_layers - 1) * h_pad * h_pad + h_pad * c_pad)
    transcendentals = n_layers * h_pad                     # one rsqrt per feature per layer
    bytes_accessed = (sum(_nbytes(a.shape, a.dtype) for a in flat_inputs)
                      + _nbytes((B, c_pad), jnp.float32))

    kernel = functools.partial(_mlp_kernel, n_layers, eps, 1.0 / B, mxu_dtype)
    out_p = pl.pallas_call(
        kernel,
        out_shape=jax.ShapeDtypeStruct((B, c_pad), jnp.float32),
        in_specs=[vmem_spec] * len(flat_inputs),
        out_specs=vmem_spec,
        cost_estimate=pl.CostEstimate(flops=flops,
                                      transcendentals=transcendentals,
                                      bytes_accessed=bytes_accessed),
        compiler_params=pltpu.CompilerParams(vmem_limit_bytes=64 * 1024 * 1024),
    )(*flat_inputs)
    return out_p[:, :n_classes]


def _reference_forward(x, hidden_params, final_w, final_b, eps=1e-5):
    """Pure-JAX f32 reference with full PyTorch semantics (incl. hidden biases)."""
    h = x
    for (w, b, g, beta) in hidden_params:
        h = h @ w + b
        mean = jnp.mean(h, axis=0, keepdims=True)
        var = jnp.mean(jnp.square(h - mean), axis=0, keepdims=True)
        h = (h - mean) / jnp.sqrt(var + eps) * g + beta
        h = jnp.maximum(h, 0.0)
    h = jnp.maximum(h, 0.0)
    return h @ final_w + final_b


if __name__ == "__main__":
    # Small config: x_dim=32, h_dim=32, n_layers=2, n_classes=3, batch=8
    B, X_DIM, H_DIM, N_LAYERS, N_CLASSES = 8, 32, 32, 2, 3

    key = jax.random.PRNGKey(0)
    keys = jax.random.split(key, 2 * (N_LAYERS + 1) + 1)

    x = jax.random.normal(keys[0], (B, X_DIM), dtype=jnp.float32)

    hidden_params = []
    in_dim = X_DIM
    for i in range(N_LAYERS):
        w = jax.random.normal(keys[1 + 2 * i], (in_dim, H_DIM), dtype=jnp.float32) * 0.1
        b = jax.random.normal(keys[2 + 2 * i], (H_DIM,), dtype=jnp.float32) * 0.1
        gamma = jnp.ones((H_DIM,), dtype=jnp.float32)   # PyTorch BN init
        beta = jnp.zeros((H_DIM,), dtype=jnp.float32)   # PyTorch BN init
        hidden_params.append((w, b, gamma, beta))
        in_dim = H_DIM

    final_w = jax.random.normal(keys[-2], (H_DIM, N_CLASSES), dtype=jnp.float32) * 0.1
    final_b = jax.random.normal(keys[-1], (N_CLASSES,), dtype=jnp.float32) * 0.1

    ref = _reference_forward(x, hidden_params, final_w, final_b)

    # 1) f32-MXU path: tight semantic check (bias-drop / BN-fold are exact-math rewrites).
    out_f32 = jax.block_until_ready(
        mlp_forward(x, hidden_params, final_w, final_b, mxu_dtype=jnp.float32))
    assert out_f32.shape == (B, N_CLASSES)
    assert jnp.allclose(out_f32, ref, atol=1e-3, rtol=1e-3)

    # 2) Default bf16-MXU path (production): same math at MXU-native precision.
    out = jax.block_until_ready(mlp_forward(x, hidden_params, final_w, final_b))
    assert out.shape == (B, N_CLASSES)
    assert jnp.allclose(out, ref, atol=3e-2, rtol=3e-2)

    print("KERNEL_OK")
</pallas_src>

<mosaic_0001>
module attributes {stable_mosaic.version = 11 : i64} {
  func.func @_mlp_kernel(%arg0: memref<8x128xf32, #tpu.memory_space<vmem>>, %arg1: memref<128x128xf32, #tpu.memory_space<vmem>>, %arg2: memref<128x128xf32, #tpu.memory_space<vmem>>, %arg3: memref<4x128xf32, #tpu.memory_space<vmem>>, %arg4: memref<128x128xf32, #tpu.memory_space<vmem>>, %arg5: memref<1x128xf32, #tpu.memory_space<vmem>>, %arg6: memref<8x128xf32, #tpu.memory_space<vmem>>) attributes {dimension_semantics = [], scalar_prefetch = 0 : i64, scratch_operands = 0 : i64, tpu.core_type = #tpu.core_type<tc>} {
    %c0 = arith.constant 0 : index
    %c0_0 = arith.constant 0 : index
    %0 = vector.load %arg0[%c0, %c0_0] : memref<8x128xf32, #tpu.memory_space<vmem>>, vector<8x128xf32>
    %c0_1 = arith.constant 0 : index
    %c0_2 = arith.constant 0 : index
    %1 = vector.load %arg1[%c0_1, %c0_2] : memref<128x128xf32, #tpu.memory_space<vmem>>, vector<128x128xf32>
    %cst = arith.constant dense<0.000000e+00> : vector<8x128xf32>
    %2 = tpu.matmul %0, %1, %cst {dimension_numbers = #tpu.dot_dimension_numbers<[1], [0], [0], [1], [0, 0, 1, 1], [], []>} : vector<8x128xf32>, vector<128x128xf32>, vector<8x128xf32> -> vector<8x128xf32>
    %cst_3 = arith.constant dense<0.000000e+00> : vector<128xf32>
    %3 = vector.multi_reduction <add>, %2, %cst_3 [0] : vector<8x128xf32> to vector<128xf32>
    %4 = vector.shape_cast %3 : vector<128xf32> to vector<1x128xf32>
    %cst_4 = arith.constant 1.250000e-01 : f32
    %5 = vector.broadcast %cst_4 : f32 to vector<1x128xf32>
    %6 = arith.mulf %4, %5 : vector<1x128xf32>
    %7 = arith.mulf %2, %2 : vector<8x128xf32>
    %cst_5 = arith.constant dense<0.000000e+00> : vector<128xf32>
    %8 = vector.multi_reduction <add>, %7, %cst_5 [0] : vector<8x128xf32> to vector<128xf32>
    %9 = vector.shape_cast %8 : vector<128xf32> to vector<1x128xf32>
    %cst_6 = arith.constant 1.250000e-01 : f32
    %10 = vector.broadcast %cst_6 : f32 to vector<1x128xf32>
    %11 = arith.mulf %9, %10 : vector<1x128xf32>
    %12 = arith.mulf %6, %6 : vector<1x128xf32>
    %13 = arith.subf %11, %12 : vector<1x128xf32>
    %cst_7 = arith.constant 0.000000e+00 : f32
    %14 = vector.broadcast %cst_7 : f32 to vector<1x128xf32>
    %15 = arith.maximumf %13, %14 : vector<1x128xf32>
    %c0_8 = arith.constant 0 : index
    %c0_9 = arith.constant 0 : index
    %16 = vector.load %arg3[%c0_8, %c0_9] : memref<4x128xf32, #tpu.memory_space<vmem>>, vector<1x128xf32>
    %c1 = arith.constant 1 : index
    %c0_10 = arith.constant 0 : index
    %17 = vector.load %arg3[%c1, %c0_10] : memref<4x128xf32, #tpu.memory_space<vmem>>, vector<1x128xf32>
    %cst_11 = arith.constant 9.99999974E-6 : f32
    %18 = vector.broadcast %cst_11 : f32 to vector<1x128xf32>
    %19 = arith.addf %15, %18 : vector<1x128xf32>
    %20 = math.rsqrt %19 : vector<1x128xf32>
    %21 = arith.mulf %16, %20 : vector<1x128xf32>
    %22 = arith.mulf %6, %21 : vector<1x128xf32>
    %23 = arith.subf %17, %22 : vector<1x128xf32>
    %24 = vector.broadcast %21 : vector<1x128xf32> to vector<8x128xf32>
    %25 = arith.mulf %2, %24 : vector<8x128xf32>
    %26 = vector.broadcast %23 : vector<1x128xf32> to vector<8x128xf32>
    %27 = arith.addf %25, %26 : vector<8x128xf32>
    %cst_12 = arith.constant 0.000000e+00 : f32
    %28 = vector.broadcast %cst_12 : f32 to vector<8x128xf32>
    %29 = arith.maximumf %27, %28 : vector<8x128xf32>
    %c0_13 = arith.constant 0 : index
    %c0_14 = arith.constant 0 : index
    %30 = vector.load %arg2[%c0_13, %c0_14] : memref<128x128xf32, #tpu.memory_space<vmem>>, vector<128x128xf32>
    %cst_15 = arith.constant dense<0.000000e+00> : vector<8x128xf32>
    %31 = tpu.matmul %29, %30, %cst_15 {dimension_numbers = #tpu.dot_dimension_numbers<[1], [0], [0], [1], [0, 0, 1, 1], [], []>} : vector<8x128xf32>, vector<128x128xf32>, vector<8x128xf32> -> vector<8x128xf32>
    %cst_16 = arith.constant dense<0.000000e+00> : vector<128xf32>
    %32 = vector.multi_reduction <add>, %31, %cst_16 [0] : vector<8x128xf32> to vector<128xf32>
    %33 = vector.shape_cast %32 : vector<128xf32> to vector<1x128xf32>
    %cst_17 = arith.constant 1.250000e-01 : f32
    %34 = vector.broadcast %cst_17 : f32 to vector<1x128xf32>
    %35 = arith.mulf %33, %34 : vector<1x128xf32>
    %36 = arith.mulf %31, %31 : vector<8x128xf32>
    %cst_18 = arith.constant dense<0.000000e+00> : vector<128xf32>
    %37 = vector.multi_reduction <add>, %36, %cst_18 [0] : vector<8x128xf32> to vector<128xf32>
    %38 = vector.shape_cast %37 : vector<128xf32> to vector<1x128xf32>
    %cst_19 = arith.constant 1.250000e-01 : f32
    %39 = vector.broadcast %cst_19 : f32 to vector<1x128xf32>
    %40 = arith.mulf %38, %39 : vector<1x128xf32>
    %41 = arith.mulf %35, %35 : vector<1x128xf32>
    %42 = arith.subf %40, %41 : vector<1x128xf32>
    %cst_20 = arith.constant 0.000000e+00 : f32
    %43 = vector.broadcast %cst_20 : f32 to vector<1x128xf32>
    %44 = arith.maximumf %42, %43 : vector<1x128xf32>
    %c2 = arith.constant 2 : index
    %c0_21 = arith.constant 0 : index
    %45 = vector.load %arg3[%c2, %c0_21] : memref<4x128xf32, #tpu.memory_space<vmem>>, vector<1x128xf32>
    %c3 = arith.constant 3 : index
    %c0_22 = arith.constant 0 : index
    %46 = vector.load %arg3[%c3, %c0_22] : memref<4x128xf32, #tpu.memory_space<vmem>>, vector<1x128xf32>
    %cst_23 = arith.constant 9.99999974E-6 : f32
    %47 = vector.broadcast %cst_23 : f32 to vector<1x128xf32>
    %48 = arith.addf %44, %47 : vector<1x128xf32>
    %49 = math.rsqrt %48 : vector<1x128xf32>
    %50 = arith.mulf %45, %49 : vector<1x128xf32>
    %51 = arith.mulf %35, %50 : vector<1x128xf32>
    %52 = arith.subf %46, %51 : vector<1x128xf32>
    %53 = vector.broadcast %50 : vector<1x128xf32> to vector<8x128xf32>
    %54 = arith.mulf %31, %53 : vector<8x128xf32>
    %55 = vector.broadcast %52 : vector<1x128xf32> to vector<8x128xf32>
    %56 = arith.addf %54, %55 : vector<8x128xf32>
    %cst_24 = arith.constant 0.000000e+00 : f32
    %57 = vector.broadcast %cst_24 : f32 to vector<8x128xf32>
    %58 = arith.maximumf %56, %57 : vector<8x128xf32>
    %c0_25 = arith.constant 0 : index
    %c0_26 = arith.constant 0 : index
    %59 = vector.load %arg4[%c0_25, %c0_26] : memref<128x128xf32, #tpu.memory_space<vmem>>, vector<128x128xf32>
    %cst_27 = arith.constant dense<0.000000e+00> : vector<8x128xf32>
    %60 = tpu.matmul %58, %59, %cst_27 {dimension_numbers = #tpu.dot_dimension_numbers<[1], [0], [0], [1], [0, 0, 1, 1], [], []>} : vector<8x128xf32>, vector<128x128xf32>, vector<8x128xf32> -> vector<8x128xf32>
    %c0_28 = arith.constant 0 : index
    %c0_29 = arith.constant 0 : index
    %61 = vector.load %arg5[%c0_28, %c0_29] : memref<1x128xf32, #tpu.memory_space<vmem>>, vector<1x128xf32>
    %62 = vector.broadcast %61 : vector<1x128xf32> to vector<8x128xf32>
    %63 = arith.addf %60, %62 : vector<8x128xf32>
    %c0_30 = arith.constant 0 : index
    %c0_31 = arith.constant 0 : index
    %64 = vector.load %arg6[%c0_30, %c0_31] : memref<8x128xf32, #tpu.memory_space<vmem>>, vector<8x128xf32>
    tpu.vector_store %arg6[%c0_30, %c0_31], %63 {strides = array<i32>} : memref<8x128xf32, #tpu.memory_space<vmem>>, vector<8x128xf32>,
    return
  }
}

</mosaic_0001>

<bundles_post_ra>
// kernel: tpu_custom_call.1
= control target key start
LH: loop header
LB: loop body
LE: loop exit
PB: predicated region body
PF: predicated region fallthrough
CT: control target
= control target key end

     0   :  { %11 = vsyncpa [#allocation3], 0  ;;  %s538_s0 = inlined_call_operand.hbm [shape: f32[8,128], index: 0, kind: input, shape index: {}]   ;;  %s539_s1 = inlined_call_operand.hbm [shape: f32[128,128], index: 1, kind: input, shape index: {}]   ;;  %s540_s2 = inlined_call_operand.hbm [shape: f32[128,128], index: 2, kind: input, shape index: {}]   ;;  %s541_s3 = inlined_call_operand.hbm [shape: f32[4,128], index: 3, kind: input, shape index: {}]   ;;  %s542_s4 = inlined_call_operand.hbm [shape: f32[128,128], index: 4, kind: input, shape index: {}]   ;;  %s543_s5 = inlined_call_operand.vmem [shape: f32[1,128], index: 5, kind: input, shape index: {}]   ;;  %s544_s6 = inlined_call_operand.hbm [shape: f32[8,128], index: 6, kind: output, shape index: {}]  }
   0x1   :  { %12 = vsyncpa [#allocation6], 0 }
   0x2   :  { %13 = vsyncpa [#allocation9], 0  ;;  %s30_s23 = sshll.u32 %s539_s1, 4  ;;  %s31_s23 = int_to_ptr.hbm [resolvable:$true] %s30_s23 }
   0x3   :  { %14 = vsyncpa [#allocation4], 0  ;;  %s474_s24 = smov [#allocation5]   ;;  %s57_s28 = sshll.u32 %s541_s3, 4  ;;  %s58_s28 = int_to_ptr.hbm [resolvable:$true] %s57_s28 }
   0x4   :  { %s32_s25 = sshll.u32 %s474_s24, 4  ;;  %s475_s29 = smov 128   ;;  %s33_s25 = int_to_ptr.vmem [resolvable:$true] %s32_s25 }
   0x5   :  { %s476_s30 = smov 8   ;;  %s477_s7 = smov [#allocation8]  }
   0x6   :  { %38 = dma.hbm_to_vmem [thread:$0]  %s31_s23, 2048, %s33_s25, [#allocation6], %s475_s29, %s475_s29, %s476_s30  }
   0x7   :  { %s59_s8 = sshll.u32 %s477_s7, 4  ;;  %s20_s11 = sshll.u32 %s538_s0, 4  ;;  %s60_s8 = int_to_ptr.vmem [resolvable:$true] %s59_s8  ;;  %s21_s11 = int_to_ptr.hbm [resolvable:$true] %s20_s11 }
   0x8   :  { %62 = dma.hbm_to_vmem [thread:$0]  %s58_s28, 64, %s60_s8, [#allocation9]  }
   0x9   :  { %s43_s13 = sshll.u32 %s540_s2, 4  ;;  %s478_s14 = smov [#allocation2]   ;;  %s44_s13 = int_to_ptr.hbm [resolvable:$true] %s43_s13 }
   0xa   :  { %s22_s15 = sshll.u32 %s478_s14, 4  ;;  %s479_s3 = smov [#allocation7]   ;;  %s23_s15 = int_to_ptr.vmem [resolvable:$true] %s22_s15 }
   0xb   :  { %25 = dma.hbm_to_vmem [thread:$0]  %s21_s11, 128, %s23_s15, [#allocation3]  }
   0xc   :  { %s45_s16 = sshll.u32 %s479_s3, 4  ;;  %s67_s19 = sshll.u32 %s542_s4, 4  ;;  %s46_s16 = int_to_ptr.vmem [resolvable:$true] %s45_s16  ;;  %s68_s19 = int_to_ptr.hbm [resolvable:$true] %s67_s19 }
   0xd   :  { %51 = dma.hbm_to_vmem [thread:$0]  %s44_s13, 2048, %s46_s16, [#allocation6], %s475_s29, %s475_s29, %s476_s30  }
   0xe   :  { %s480_s0 = smov [#allocation10]  }
   0xf   :  { %s69_s20 = sshll.u32 %s480_s0, 4  ;;  %s70_s20 = int_to_ptr.vmem [resolvable:$true] %s69_s20 }
  0x10   :  { %75 = dma.hbm_to_vmem [thread:$0]  %s68_s19, 2048, %s70_s20, [#allocation9], %s475_s29, %s475_s29, %s476_s30  }
  0x11   :  { %466 = dma.done.wait [#allocation3], 128  }
  0x12   :  { %467 = vsyncadd [#allocation3], 4294967168 }
  0x13   :  { %468 = dma.done.wait [#allocation6], 4096  }
  0x14   :  { %469 = vsyncadd [#allocation6], 4294963200 }
  0x15   :  { %470 = dma.done.wait [#allocation9], 2112  }
  0x16   :  { %471 = vsyncadd [#allocation9], 4294965184  ;;  %v114_v0 = vld [vmem:[#allocation5 + $0x78] sm:$0xff]  ;;  %v113_v1 = vld [vmem:[#allocation5 + $0x70] sm:$0xff]  ;;  %s481_s21 = smov [#allocation11]   ;;  %s297_s25 = sshll.u32 %s544_s6, 4  ;;  %s298_s25 = int_to_ptr.hbm [resolvable:$true] %s297_s25 }
  0x17   :  { %115 = vmatpush.msra.mxu0 %v114_v0  ;;  %v112_v2 = vld [vmem:[#allocation5 + $0x68] sm:$0xff]  ;;  %v111_v3 = vld [vmem:[#allocation5 + $0x60] sm:$0xff]  ;;  %v110_v4 = vld [vmem:[#allocation5 + $0x58] sm:$0xff]  ;;  %s295_s22 = sshll.u32 %s481_s21, 4  ;;  %s296_s22 = int_to_ptr.vmem [resolvable:$true] %s295_s22 }
  0x18   :  { %v109_v5 = vld [vmem:[#allocation5 + $0x50] sm:$0xff]  ;;  %v108_v6 = vld [vmem:[#allocation5 + $0x48] sm:$0xff]  ;;  %v107_v7 = vld [vmem:[#allocation5 + $0x40] sm:$0xff] }
  0x19   :  { %116 = vmatpush.msra.mxu0 %v113_v1  ;;  %v106_v8 = vld [vmem:[#allocation5 + $0x38] sm:$0xff]  ;;  %v105_v9 = vld [vmem:[#allocation5 + $0x30] sm:$0xff]  ;;  %v104_v10 = vld [vmem:[#allocation5 + $0x28] sm:$0xff] }
  0x1a   :  { %v103_v11 = vld [vmem:[#allocation5 + $0x20] sm:$0xff]  ;;  %v102_v12 = vld [vmem:[#allocation5 + $0x18] sm:$0xff]  ;;  %v101_v13 = vld [vmem:[#allocation5 + $0x10] sm:$0xff] }
  0x1b   :  { %117 = vmatpush.msra.mxu0 %v112_v2  ;;  %v100_v14 = vld [vmem:[#allocation5 + $0x8] sm:$0xff]  ;;  %v99_v15 = vld [vmem:[#allocation5] sm:$0xff]  ;;  %v98_v16 = vld [vmem:[#allocation2] sm:$0xff] }
  0x1c   :  { %v189_v17 = vld [vmem:[#allocation7 + $0x78] sm:$0xff]  ;;  %v188_v18 = vld [vmem:[#allocation7 + $0x70] sm:$0xff]  ;;  %v187_v19 = vld [vmem:[#allocation7 + $0x68] sm:$0xff] }
  0x1d   :  { %118 = vmatpush.msra.mxu0 %v111_v3  ;;  %190 = vmatpush.msra.mxu1 %v189_v17  ;;  %v186_v20 = vld [vmem:[#allocation7 + $0x60] sm:$0xff]  ;;  %v185_v21 = vld [vmem:[#allocation7 + $0x58] sm:$0xff]  ;;  %v184_v22 = vld [vmem:[#allocation7 + $0x50] sm:$0xff] }
  0x1e   :  { %v183_v26 = vld [vmem:[#allocation7 + $0x48] sm:$0xff]  ;;  %v182_v29 = vld [vmem:[#allocation7 + $0x40] sm:$0xff]  ;;  %v181_v32 = vld [vmem:[#allocation7 + $0x38] sm:$0xff] }
  0x1f   :  { %119 = vmatpush.msra.mxu0 %v110_v4  ;;  %191 = vmatpush.msra.mxu1 %v188_v18  ;;  %v180_v35 = vld [vmem:[#allocation7 + $0x30] sm:$0xff]  ;;  %v179_v38 = vld [vmem:[#allocation7 + $0x28] sm:$0xff]  ;;  %v178_v41 = vld [vmem:[#allocation7 + $0x20] sm:$0xff] }
  0x20   :  { %v177_v44 = vld [vmem:[#allocation7 + $0x18] sm:$0xff]  ;;  %v176_v45 = vld [vmem:[#allocation7 + $0x10] sm:$0xff]  ;;  %v175_v48 = vld [vmem:[#allocation7 + $0x8] sm:$0xff] }
  0x21   :  { %120 = vmatpush.msra.mxu0 %v109_v5  ;;  %192 = vmatpush.msra.mxu1 %v187_v19  ;;  %v174_v50 = vld [vmem:[#allocation7] sm:$0xff] }
  0x22   :  { %v153_v58 = vld [vmem:[#allocation8] sm:$0x1]  ;;  %v154_v62 = vld [vmem:[#allocation8 + $0x1] sm:$0x1]  ;;  %v257_v18 = vld [vmem:[#allocation10 + $0x40] sm:$0xff] }
  0x23   :  { %121 = vmatpush.msra.mxu0 %v108_v6  ;;  %193 = vmatpush.msra.mxu1 %v186_v20  ;;  %v264_v6 = vld [vmem:[#allocation10 + $0x78] sm:$0xff] }
  0x24   :  { %269 = vmatpush.msra.mxu2 %v264_v6 }
  0x25   :  { %122 = vmatpush.msra.mxu0 %v107_v7  ;;  %194 = vmatpush.msra.mxu1 %v185_v21  ;;  %v263_v7 = vld [vmem:[#allocation10 + $0x70] sm:$0xff]  ;;  %v256_v21 = vld [vmem:[#allocation10 + $0x38] sm:$0xff] }
  0x26   :  { %270 = vmatpush.msra.mxu2 %v263_v7 }
  0x27   :  { %123 = vmatpush.msra.mxu0 %v106_v8  ;;  %195 = vmatpush.msra.mxu1 %v184_v22  ;;  %v262_v8 = vld [vmem:[#allocation10 + $0x68] sm:$0xff] }
  0x28   :  { %271 = vmatpush.msra.mxu2 %v262_v8 }
  0x29   :  { %124 = vmatpush.msra.mxu0 %v105_v9  ;;  %196 = vmatpush.msra.mxu1 %v183_v26  ;;  %v261_v9 = vld [vmem:[#allocation10 + $0x60] sm:$0xff] }
  0x2a   :  { %272 = vmatpush.msra.mxu2 %v261_v9 }
  0x2b   :  { %125 = vmatpush.msra.mxu0 %v104_v10  ;;  %197 = vmatpush.msra.mxu1 %v182_v29  ;;  %v260_v10 = vld [vmem:[#allocation10 + $0x58] sm:$0xff] }
  0x2c   :  { %273 = vmatpush.msra.mxu2 %v260_v10 }
  0x2d   :  { %126 = vmatpush.msra.mxu0 %v103_v11  ;;  %198 = vmatpush.msra.mxu1 %v181_v32  ;;  %v259_v11 = vld [vmem:[#allocation10 + $0x50] sm:$0xff] }
  0x2e   :  { %274 = vmatpush.msra.mxu2 %v259_v11 }
  0x2f   :  { %127 = vmatpush.msra.mxu0 %v102_v12  ;;  %199 = vmatpush.msra.mxu1 %v180_v35 }
  0x31   :  { %128 = vmatpush.msra.mxu0 %v101_v13  ;;  %200 = vmatpush.msra.mxu1 %v179_v38 }
  0x33   :  { %129 = vmatpush.msra.mxu0 %v100_v14  ;;  %201 = vmatpush.msra.mxu1 %v178_v41 }
  0x35   :  { %130 = vmatpush.msra.mxu0 %v99_v15  ;;  %202 = vmatpush.msra.mxu1 %v177_v44  ;;  %v258_v15 = vld [vmem:[#allocation10 + $0x48] sm:$0xff] }
  0x36   :  { %131 = vmatmul.f32.vlgmr.msra.gmra.mxu0 %v98_v16  ;;  %275 = vmatpush.msra.mxu2 %v258_v15 }
  0x37   :  { %203 = vmatpush.msra.mxu1 %v176_v45 }
  0x38   :  { %276 = vmatpush.msra.mxu2 %v257_v18 }
  0x39   :  { %204 = vmatpush.msra.mxu1 %v175_v48 }
  0x3a   :  { %277 = vmatpush.msra.mxu2 %v256_v21 }
  0x3b   :  { %205 = vmatpush.msra.mxu1 %v174_v50 }
  0xb3   :  { %v132_v23 = vpop.f32.mrf.mxu0 }
  0xb4   :  { %v135_v24 = vrot.slane %v132_v23, 4  ;;  %v142_v25 = vmul.f32 %v132_v23, %v132_v23 }
  0xb6   :  { %v136_v27 = vadd.f32 %v135_v24, %v132_v23  ;;  %v143_v28 = vrot.slane %v142_v25, 4  ;;  %v255_v24 = vld [vmem:[#allocation10 + $0x30] sm:$0xff] }
  0xb7   :  { %278 = vmatpush.msra.mxu2 %v255_v24 }
  0xb8   :  { %v137_v30 = vrot.slane %v136_v27, 2  ;;  %v144_v31 = vadd.f32 %v143_v28, %v142_v25 }
  0xba   :  { %v138_v33 = vadd.f32 %v137_v30, %v136_v27  ;;  %v145_v34 = vrot.slane %v144_v31, 2  ;;  %v254_v27 = vld [vmem:[#allocation10 + $0x28] sm:$0xff]  ;;  %v253_v30 = vld [vmem:[#allocation10 + $0x20] sm:$0xff] }
  0xbb   :  { %279 = vmatpush.msra.mxu2 %v254_v27 }
  0xbc   :  { %v139_v36 = vrot.slane %v138_v33, 1  ;;  %v146_v37 = vadd.f32 %v145_v34, %v144_v31  ;;  %v251_v34 = vld [vmem:[#allocation10 + $0x10] sm:$0xff] }
  0xbd   :  { %280 = vmatpush.msra.mxu2 %v253_v30 }
  0xbe   :  { %v140_v39 = vadd.f32 %v139_v36, %v138_v33  ;;  %v147_v40 = vrot.slane %v146_v37, 1  ;;  %v252_v33 = vld [vmem:[#allocation10 + $0x18] sm:$0xff] }
  0xbf   :  { %281 = vmatpush.msra.mxu2 %v252_v33 }
  0xc0   :  { %v141_v42 = vmul.f32 0.125, %v140_v39  ;;  %v148_v43 = vadd.f32 %v147_v40, %v146_v37  ;;  %v250_v37 = vld [vmem:[#allocation10 + $0x8] sm:$0xff]  ;;  %v249_v39 = vld [vmem:[#allocation10] sm:$0xff] }
  0xc1   :  { %282 = vmatpush.msra.mxu2 %v251_v34 }
  0xc2   :  { %v149_v46 = vmul.f32 0.125, %v148_v43  ;;  %v150_v47 = vmul.f32 %v141_v42, %v141_v42 }
  0xc3   :  { %283 = vmatpush.msra.mxu2 %v250_v37 }
  0xc4   :  { %v151_v49 = vsub.f32 %v149_v46, %v150_v47  ;;  %v228_v47 = vld [vmem:[#allocation8 + $0x2] sm:$0x1] }
  0xc5   :  { %284 = vmatpush.msra.mxu2 %v249_v39 }
  0xc6   :  { %v152_v51 = vmax.f32 %v151_v49, 0.0 }
  0xc8   :  { %v155_v52 = vadd.f32 1e-05, %v152_v51  ;;  %v229_v51 = vld [vmem:[#allocation8 + $0x3] sm:$0x1] }
  0xca   :  { %318 = vrsqrt.f32 %v155_v52  ;;  %vm162_vm1 = vweird.f32 %v155_v52 }
  0xd0   :  { %v319_v53 = vpop.eup %318 }
  0xd1   :  { %v157_v54 = vmul.f32 %v319_v53, %v155_v52  ;;  %vm163_vm0 = vweird.f32 %v319_v53 }
  0xd2   :  { %vm164_vm2 = vmor %vm162_vm1, %vm163_vm0 }
  0xd3   :  { %v158_v55 = vmul.f32 %v319_v53, %v157_v54 }
  0xd5   :  { %v159_v56 = vmul.f32 0.5, %v158_v55 }
  0xd7   :  { %v160_v57 = vsub.f32 1.5, %v159_v56 }
  0xd9   :  { %v161_v59 = vmul.f32 %v319_v53, %v160_v57 }
  0xdb   :  { %v165_v60 = vsel %vm164_vm2, %v319_v53, %v161_v59  ;;  %v317_v59 = vld [vmem:[%s543_s5] ss:$0 sm:$0xff] }
  0xdc   :  { %v166_v61 = vmul.f32 %v165_v60, %v153_v58 }
  0xde   :  { %v169_v63 = vperm.slane %v166_v61, 0  ;;  %v167_v0 = vmul.f32 %v166_v61, %v141_v42 }
  0xe0   :  { %v168_v1 = vsub.f32 %v154_v62, %v167_v0  ;;  %v170_v2 = vmul.f32 %v169_v63, %v132_v23 }
  0xe2   :  { %v171_v3 = vperm.slane %v168_v1, 0 }
  0xe4   :  { %v172_v4 = vadd.f32 %v171_v3, %v170_v2 }
  0xe6   :  { %v173_v5 = vmax.f32 %v172_v4, 0.0 }
  0xe8   :  { %206 = vmatmul.f32.vlgmr.msra.gmra.mxu1 %v173_v5 }
 0x165   :  { %v207_v12 = vpop.f32.mrf.mxu1 }
 0x166   :  { %v210_v13 = vrot.slane %v207_v12, 4  ;;  %v217_v14 = vmul.f32 %v207_v12, %v207_v12 }
 0x168   :  { %v211_v16 = vadd.f32 %v210_v13, %v207_v12  ;;  %v218_v17 = vrot.slane %v217_v14, 4 }
 0x16a   :  { %v212_v19 = vrot.slane %v211_v16, 2  ;;  %v219_v20 = vadd.f32 %v218_v17, %v217_v14 }
 0x16c   :  { %v213_v22 = vadd.f32 %v212_v19, %v211_v16  ;;  %v220_v23 = vrot.slane %v219_v20, 2 }
 0x16e   :  { %v214_v25 = vrot.slane %v213_v22, 1  ;;  %v221_v26 = vadd.f32 %v220_v23, %v219_v20 }
 0x170   :  { %v215_v28 = vadd.f32 %v214_v25, %v213_v22  ;;  %v222_v29 = vrot.slane %v221_v26, 1 }
 0x172   :  { %v216_v31 = vmul.f32 0.125, %v215_v28  ;;  %v223_v32 = vadd.f32 %v222_v29, %v221_v26 }
 0x174   :  { %v224_v35 = vmul.f32 0.125, %v223_v32  ;;  %v225_v36 = vmul.f32 %v216_v31, %v216_v31 }
 0x176   :  { %v226_v38 = vsub.f32 %v224_v35, %v225_v36 }
 0x178   :  { %v227_v40 = vmax.f32 %v226_v38, 0.0 }
 0x17a   :  { %v230_v41 = vadd.f32 1e-05, %v227_v40 }
 0x17c   :  { %320 = vrsqrt.f32 %v230_v41  ;;  %vm237_vm4 = vweird.f32 %v230_v41 }
 0x182   :  { %v321_v42 = vpop.eup %320 }
 0x183   :  { %v232_v43 = vmul.f32 %v321_v42, %v230_v41  ;;  %vm238_vm3 = vweird.f32 %v321_v42 }
 0x184   :  { %vm239_vm5 = vmor %vm237_vm4, %vm238_vm3 }
 0x185   :  { %v233_v44 = vmul.f32 %v321_v42, %v232_v43 }
 0x187   :  { %v234_v45 = vmul.f32 0.5, %v233_v44 }
 0x189   :  { %v235_v46 = vsub.f32 1.5, %v234_v45 }
 0x18b   :  { %v236_v48 = vmul.f32 %v321_v42, %v235_v46 }
 0x18d   :  { %v240_v49 = vsel %vm239_vm5, %v321_v42, %v236_v48 }
 0x18e   :  { %v241_v50 = vmul.f32 %v240_v49, %v228_v47 }
 0x190   :  { %v244_v52 = vperm.slane %v241_v50, 0  ;;  %v242_v53 = vmul.f32 %v241_v50, %v216_v31 }
 0x192   :  { %v243_v54 = vsub.f32 %v229_v51, %v242_v53  ;;  %v245_v55 = vmul.f32 %v244_v52, %v207_v12 }
 0x194   :  { %v246_v56 = vperm.slane %v243_v54, 0 }
 0x196   :  { %v247_v57 = vadd.f32 %v246_v56, %v245_v55 }
 0x198   :  { %v248_v58 = vmax.f32 %v247_v57, 0.0 }
 0x19a   :  { %285 = vmatmul.f32.vlgmr.msra.gmra.mxu2 %v248_v58 }
 0x21d   :  { %v286_v60 = vpop.f32.mrf.mxu2 }
 0x21e   :  { %v287_v61 = vadd.f32 %v317_v59, %v286_v60 }
 0x220   :  { %289 = vst [vmem:[#allocation11] sm:$0xff] %v287_v61 }
 0x221   :  { %300 = dma.vmem_to_hbm [thread:$0]  %s296_s22, 128, %s298_s25, [#allocation4]  }
 0x222   :  { %472 = dma.done.wait [#allocation4], 128  }
 0x223   :  { %473 = vsyncadd [#allocation4], 4294967168 }
 0x224   :  { %305 = vsyncpa [#allocation3], 1 }
 0x225   :  { %306 = vsyncpa [#allocation6], 1 }
 0x226   :  { %307 = vsyncpa [#allocation9], 1 }
 0x227   :  { %308 = vsyncpa [#allocation4], 1 }

</bundles_post_ra>
